<compile_context>
chip_gen: v5e
topology: v5e:2x2
jax: 0.10.0
libtpu: 0.0.40
codegen_flags: <defaults>
</compile_context>

<pallas_src>
import jax
import jax.numpy as jnp
from jax.experimental import pallas as pl
from jax.experimental.pallas import tpu as pltpu

_LANE = 1024                      # lane width of the dense slab (multiple of 128)
_ROW_TILE_MAX = 1024              # max rows per block -> 4 MiB f32 input block
_PALLAS_MIN_ELEMS = 8 * _LANE     # below this, plain XLA is strictly faster


def _round_up(n, m):
    return ((n + m - 1) // m) * m


def _linear1x1_kernel(w_ref, b_ref, x_ref, o_ref):
    # w_ref, b_ref: (1, 1) f32 scalars in SMEM.
    # x_ref, o_ref: (row_tile, _LANE) dense blocks in VMEM.
    w = w_ref[0, 0]
    b = b_ref[0, 0]
    # Pure VPU work: one vmul + one vadd per vreg; no MXU, no transpose.
    o_ref[...] = (x_ref[...] * w + b).astype(o_ref.dtype)


def _linear1x1_jax(x, w_scalar, b_scalar):
    # Plain-JAX fused path (XLA fuses the FMA); used for tiny inputs / tails.
    return (x.astype(jnp.float32) * w_scalar + b_scalar).astype(x.dtype)


def regression_model_forward(x, weight, bias):
    """y = x @ weight.T + bias, matching torch.nn.Linear(1, 1)."""
    batch, in_features = x.shape
    out_features = weight.shape[0]
    assert in_features == 1 and out_features == 1, "kernel specialized to Linear(1, 1)"

    w_scalar = weight.astype(jnp.float32).reshape(())
    b_scalar = bias.astype(jnp.float32).reshape(())

    # Tiny batch: launch/DMA overhead dominates any Pallas kernel -> plain XLA.
    if batch < _PALLAS_MIN_ELEMS:
        return _linear1x1_jax(x, w_scalar, b_scalar).reshape(batch, out_features)

    x_flat = x.reshape(batch)
    n_main = (batch // _LANE) * _LANE          # largest lane-aligned prefix
    rows = n_main // _LANE                     # >= 8 given _PALLAS_MIN_ELEMS

    # Dense (rows, 1024) slab; free bitcast-style reshape of a contiguous prefix.
    x_main = x_flat[:n_main].reshape(rows, _LANE)

    # Multi-MiB blocks, sublane dim a multiple of 8, >= 2 grid steps when possible.
    row_tile = min(_ROW_TILE_MAX, _round_up(pl.cdiv(rows, 2), 8))
    grid = (pl.cdiv(rows, row_tile),)          # ragged final block handled by Pallas

    w_s = weight.reshape(1, 1).astype(jnp.float32)
    b_s = bias.reshape(1, 1).astype(jnp.float32)

    itemsize = jnp.dtype(x.dtype).itemsize
    y_main = pl.pallas_call(
        _linear1x1_kernel,
        out_shape=jax.ShapeDtypeStruct((rows, _LANE), x.dtype),
        grid=grid,
        in_specs=[
            pl.BlockSpec(memory_space=pltpu.MemorySpace.SMEM),      # weight scalar
            pl.BlockSpec(memory_space=pltpu.MemorySpace.SMEM),      # bias scalar
            pl.BlockSpec((row_tile, _LANE), lambda i: (i, 0)),      # x slab
        ],
        out_specs=pl.BlockSpec((row_tile, _LANE), lambda i: (i, 0)),
        compiler_params=pltpu.CompilerParams(
            dimension_semantics=("parallel",),
            vmem_limit_bytes=48 << 20,
        ),
        cost_estimate=pl.CostEstimate(
            flops=2 * n_main,
            transcendentals=0,
            bytes_accessed=2 * n_main * itemsize + 8,
        ),
    )(w_s, b_s, x_main)

    y_flat = y_main.reshape(n_main)
    if n_main < batch:
        # Sub-lane-width tail (< 1024 elems): cheaper in plain JAX than padding
        # the whole array through HBM.
        tail = _linear1x1_jax(x_flat[n_main:], w_scalar, b_scalar)
        y_flat = jnp.concatenate([y_flat, tail])

    return y_flat.reshape(batch, out_features)


if __name__ == "__main__":
    input_size = 1
    output_size = 1

    key = jax.random.PRNGKey(0)
    kw, kb, kx1, kx2, kx3, kx4 = jax.random.split(key, 6)

    # Deterministic parameter init (mirrors nn.Linear's U(-1/sqrt(in), 1/sqrt(in))).
    bound = 1.0 / (input_size ** 0.5)
    weight = jax.random.uniform(
        kw, (output_size, input_size), jnp.float32, minval=-bound, maxval=bound)
    bias = jax.random.uniform(
        kb, (output_size,), jnp.float32, minval=-bound, maxval=bound)

    # batch=8      -> plain-JAX bypass path (tiny input)
    # batch=8192   -> Pallas path, evenly divisible, single block
    # batch=20480  -> Pallas path, 2 parallel blocks + ragged final block
    # batch=9001   -> Pallas main slab + plain-JAX tail
    for kx, batch in ((kx1, 8), (kx2, 8192), (kx3, 20480), (kx4, 9001)):
        x = jax.random.normal(kx, (batch, input_size), jnp.float32)
        y = regression_model_forward(x, weight, bias)
        jax.block_until_ready(y)

        y_ref = x @ weight.T + bias
        assert y.shape == (batch, output_size)
        assert jnp.allclose(y, y_ref, atol=1e-5, rtol=1e-5), f"mismatch at batch={batch}"

    print("KERNEL_OK")
</pallas_src>

<mosaic_0001>
module attributes {stable_mosaic.version = 11 : i64} {
  func.func @_linear1x1_kernel(%arg0: i32, %arg1: memref<1x1xf32, #tpu.memory_space<smem>>, %arg2: memref<1x1xf32, #tpu.memory_space<smem>>, %arg3: memref<8x1024xf32, #tpu.memory_space<vmem>>, %arg4: memref<8x1024xf32, #tpu.memory_space<vmem>>) attributes {dimension_semantics = [#tpu.dimension_semantics<parallel>], iteration_bounds = array<i64: 1>, scalar_prefetch = 0 : i64, scratch_operands = 0 : i64, tpu.core_type = #tpu.core_type<tc>, window_params = [{transform_indices = @transform_0, window_bounds = array<i64: 1, 1>}, {transform_indices = @transform_1, window_bounds = array<i64: 1, 1>}, {transform_indices = @transform_2, window_bounds = array<i64: 8, 1024>}, {transform_indices = @transform_3, window_bounds = array<i64: 8, 1024>}]} {
    %c0 = arith.constant 0 : index
    %c0_0 = arith.constant 0 : index
    %0 = memref.load %arg1[%c0, %c0_0] : memref<1x1xf32, #tpu.memory_space<smem>>
    %c0_1 = arith.constant 0 : index
    %c0_2 = arith.constant 0 : index
    %1 = memref.load %arg2[%c0_1, %c0_2] : memref<1x1xf32, #tpu.memory_space<smem>>
    %c0_3 = arith.constant 0 : index
    %c0_4 = arith.constant 0 : index
    %2 = vector.load %arg3[%c0_3, %c0_4] : memref<8x1024xf32, #tpu.memory_space<vmem>>, vector<8x1024xf32>
    %3 = vector.broadcast %0 : f32 to vector<8x1024xf32>
    %4 = arith.mulf %2, %3 : vector<8x1024xf32>
    %5 = vector.broadcast %1 : f32 to vector<8x1024xf32>
    %6 = arith.addf %4, %5 : vector<8x1024xf32>
    %c0_5 = arith.constant 0 : index
    %c0_6 = arith.constant 0 : index
    %7 = vector.load %arg4[%c0_5, %c0_6] : memref<8x1024xf32, #tpu.memory_space<vmem>>, vector<8x1024xf32>
    tpu.vector_store %arg4[%c0_5, %c0_6], %6 {strides = array<i32>} : memref<8x1024xf32, #tpu.memory_space<vmem>>, vector<8x1024xf32>,
    return
  }
  func.func @transform_0(%arg0: i32) -> (i32, i32) {
    %c0_i32 = arith.constant 0 : i32
    %c0_i32_0 = arith.constant 0 : i32
    %c0_i32_1 = arith.constant 0 : i32
    return %c0_i32, %c0_i32_0 : i32, i32
  }
  func.func @transform_1(%arg0: i32) -> (i32, i32) {
    %c0_i32 = arith.constant 0 : i32
    %c0_i32_0 = arith.constant 0 : i32
    %c0_i32_1 = arith.constant 0 : i32
    return %c0_i32, %c0_i32_0 : i32, i32
  }
  func.func @transform_2(%arg0: i32) -> (i32, i32) {
    %c0_i32 = arith.constant 0 : i32
    %c0_i32_0 = arith.constant 0 : i32
    return %arg0, %c0_i32 : i32, i32
  }
  func.func @transform_3(%arg0: i32) -> (i32, i32) {
    %c0_i32 = arith.constant 0 : i32
    %c0_i32_0 = arith.constant 0 : i32
    return %arg0, %c0_i32 : i32, i32
  }
}

</mosaic_0001>

<bundles_post_ra>
// kernel: tpu_custom_call.1
= control target key start
LH: loop header
LB: loop body
LE: loop exit
PB: predicated region body
PF: predicated region fallthrough
CT: control target
= control target key end

     0   :  { %10 = vsyncpa [#allocation5], 0  ;;  %s172_s0 = inlined_call_operand.<no memory space> [shape: f32[1,1], index: 0, kind: input, shape index: {}]   ;;  %s173_s1 = inlined_call_operand.<no memory space> [shape: f32[1,1], index: 1, kind: input, shape index: {}]   ;;  %s174_s2 = inlined_call_operand.hbm [shape: f32[8,1024], index: 2, kind: input, shape index: {}]   ;;  %s175_s3 = inlined_call_operand.hbm [shape: f32[8,1024], index: 3, kind: output, shape index: {}]  }
   0x1   :  { %11 = vsyncpa [#allocation6], 0  ;;  %s21_s14 = sshll.u32 %s174_s2, 4  ;;  %s138_s15 = smov [#allocation4]   ;;  %s22_s14 = int_to_ptr.hbm [resolvable:$true] %s21_s14 }
   0x2   :  { %s23_s16 = sshll.u32 %s138_s15, 4  ;;  %s24_s16 = int_to_ptr.vmem [resolvable:$true] %s23_s16 }
   0x3   :  { %26 = dma.hbm_to_vmem [thread:$0]  %s22_s14, 1024, %s24_s16, [#allocation5]  }
   0x4   :  { %134 = dma.done.wait [#allocation5], 1024  }
   0x5   :  { %135 = vsyncadd [#allocation5], 4294966272  ;;  %v41_v0 = vstv %s172_s0  ;;  %v33_v1 = vld [vmem:[#allocation4] sm:$0xff]  ;;  %v50_v2 = vstv %s173_s1  ;;  %v34_v3 = vld [vmem:[#allocation4 + $0x8] sm:$0xff]  ;;  %s139_s0 = smov [#allocation7]   ;;  %s74_s22 = sshll.u32 %s175_s3, 4  ;;  %s75_s22 = int_to_ptr.hbm [resolvable:$true] %s74_s22 }
   0x6   :  { %v35_v4 = vld [vmem:[#allocation4 + $0x10] sm:$0xff]  ;;  %v42_v5 = vmul.f32 %v41_v0, %v33_v1  ;;  %v43_v6 = vmul.f32 %v41_v0, %v34_v3  ;;  %v36_v8 = vld [vmem:[#allocation4 + $0x18] sm:$0xff]  ;;  %v37_v9 = vld [vmem:[#allocation4 + $0x20] sm:$0xff]  ;;  %s72_s1 = sshll.u32 %s139_s0, 4  ;;  %s73_s1 = int_to_ptr.vmem [resolvable:$true] %s72_s1 }
   0x7   :  { %v44_v7 = vmul.f32 %v41_v0, %v35_v4  ;;  %v38_v10 = vld [vmem:[#allocation4 + $0x28] sm:$0xff]  ;;  %v45_v11 = vmul.f32 %v41_v0, %v36_v8  ;;  %v46_v12 = vmul.f32 %v41_v0, %v37_v9  ;;  %v39_v14 = vld [vmem:[#allocation4 + $0x30] sm:$0xff]  ;;  %v40_v15 = vld [vmem:[#allocation4 + $0x38] sm:$0xff] }
   0x8   :  { %v47_v13 = vmul.f32 %v41_v0, %v38_v10  ;;  %v51_v16 = vadd.f32 %v50_v2, %v42_v5  ;;  %v52_v17 = vadd.f32 %v50_v2, %v43_v6  ;;  %v48_v19 = vmul.f32 %v41_v0, %v39_v14 }
   0x9   :  { %v53_v18 = vadd.f32 %v50_v2, %v44_v7  ;;  %v54_v20 = vadd.f32 %v50_v2, %v45_v11  ;;  %v49_v21 = vmul.f32 %v41_v0, %v40_v15  ;;  %v55_v22 = vadd.f32 %v50_v2, %v46_v12 }
   0xa   :  { %59 = vst [vmem:[#allocation7] sm:$0xff] %v51_v16  ;;  %v56_v23 = vadd.f32 %v50_v2, %v47_v13  ;;  %v57_v24 = vadd.f32 %v50_v2, %v48_v19 }
   0xb   :  { %60 = vst [vmem:[#allocation7 + $0x8] sm:$0xff] %v52_v17  ;;  %v58_v25 = vadd.f32 %v50_v2, %v49_v21 }
   0xc   :  { %61 = vst [vmem:[#allocation7 + $0x10] sm:$0xff] %v53_v18 }
   0xd   :  { %62 = vst [vmem:[#allocation7 + $0x18] sm:$0xff] %v54_v20 }
   0xe   :  { %63 = vst [vmem:[#allocation7 + $0x20] sm:$0xff] %v55_v22 }
   0xf   :  { %64 = vst [vmem:[#allocation7 + $0x28] sm:$0xff] %v56_v23 }
  0x10   :  { %65 = vst [vmem:[#allocation7 + $0x30] sm:$0xff] %v57_v24 }
  0x11   :  { %66 = vst [vmem:[#allocation7 + $0x38] sm:$0xff] %v58_v25 }
  0x12   :  { %77 = dma.vmem_to_hbm [thread:$0]  %s73_s1, 1024, %s75_s22, [#allocation6]  }
  0x13   :  { %136 = dma.done.wait [#allocation6], 1024  }
  0x14   :  { %137 = vsyncadd [#allocation6], 4294966272 }
  0x15   :  { %82 = vsyncpa [#allocation5], 1 }
  0x16   :  { %83 = vsyncpa [#allocation6], 1 }

</bundles_post_ra>
